<compile_context>
chip_gen: v5e
topology: v5e:2x2
jax: 0.10.0
libtpu: 0.0.40
codegen_flags: <defaults>
</compile_context>

<pallas_src>
import jax
import jax.numpy as jnp
from jax.experimental import pallas as pl
from jax.experimental.pallas import tpu as pltpu


_TARGET_BLOCK_BYTES = 4 << 20    # ~4 MiB per operand per block (double-buffered)
_VMEM_LIMIT_BYTES = 48 << 20     # safe on v5e/v6e (128 MiB phys) and v7x (64 MiB phys)
_MEGACORE_MIN_BYTES = 1 << 20    # only force >=2 blocks above ~1 MiB of input


def _round_up(x: int, m: int) -> int:
    return -(-x // m) * m


def _sublane(dtype) -> int:
    # Second-minor tile granularity: 8 for 32-bit, 16 for 16-bit, 32 for 8-bit.
    return max(8, 32 // jnp.dtype(dtype).itemsize)


def _padded_slice_bytes(r: int, c: int, dtype) -> int:
    d = jnp.dtype(dtype)
    return _round_up(r, _sublane(d)) * _round_up(c, 128) * d.itemsize


def _scale_kernel(scale_ref, x_ref, o_ref):
    # scale_ref: (1,) float32 scalar in SMEM; x_ref / o_ref: VMEM tiles.
    # Math in f32 (input promoted by the f32 scalar); cast to the (promoted)
    # output dtype so stores stay unmasked vst in the output layout.
    o_ref[...] = (x_ref[...] * scale_ref[0]).astype(o_ref.dtype)


def scale_forward(x: jax.Array, scale: jax.Array, *, donate_input: bool = False) -> jax.Array:
    """Equivalent of Scale.forward: x * scale (scalar broadcast, torch promotion)."""
    scale = jnp.asarray(scale, dtype=jnp.float32).reshape((1,))
    out_dtype = jnp.promote_types(x.dtype, jnp.float32)  # torch: bf16 * f32 -> f32

    n = x.size
    if n == 0:
        return (x * scale[0]).astype(out_dtype)

    orig_shape = x.shape

    # Canonical 3-D view (B, R, C) keeping the native (sublane, lane) dims
    # untouched: merging only the leading dims is layout-compatible with the
    # tiled HBM layout, so these reshapes never materialize a relayout copy.
    if x.ndim >= 2:
        R, C = orig_shape[-2], orig_shape[-1]
        B = n // (R * C)
    else:  # 0-D / 1-D
        R, C = 1, n
        B = 1
    x3 = x.reshape(B, R, C)

    itemsize_in = jnp.dtype(x.dtype).itemsize
    itemsize_out = jnp.dtype(out_dtype).itemsize

    in_slice = _padded_slice_bytes(R, C, x.dtype)
    out_slice = _padded_slice_bytes(R, C, out_dtype)
    slice_bytes = max(in_slice, out_slice)

    if slice_bytes <= _TARGET_BLOCK_BYTES:
        # Common case: 1-D grid over the (merged) leading dim, full (R, C)
        # per slice (block last-two-dims == full array dims -> always legal).
        tb = max(1, min(B, _TARGET_BLOCK_BYTES // slice_bytes))
        # Guarantee >= 2 blocks for mid/large tensors so both v7x TCs get work.
        if B >= 2 and n * itemsize_in >= _MEGACORE_MIN_BYTES:
            tb = min(tb, pl.cdiv(B, 2))
        grid = (pl.cdiv(B, tb),)
        block = (tb, R, C)
        in_spec = pl.BlockSpec(block, lambda i: (i, 0, 0))
        out_spec = pl.BlockSpec(block, lambda i: (i, 0, 0))
        semantics = ("parallel",)
    else:
        # A single (R, C) slice exceeds the block budget (small batch, large
        # trailing dims): additionally tile rows (x32) and lanes (x128).
        max_item = max(itemsize_in, itemsize_out)
        tc = C if C <= 2048 else 2048                          # full dim or x128
        tr_budget = max(1, _TARGET_BLOCK_BYTES // (max_item * _round_up(tc, 128)))
        tr = min(R, max(32, (tr_budget // 32) * 32))           # full dim or x32
        grid = (B, pl.cdiv(R, tr), pl.cdiv(C, tc))
        block = (1, tr, tc)
        in_spec = pl.BlockSpec(block, lambda b, r, c: (b, r, c))
        out_spec = pl.BlockSpec(block, lambda b, r, c: (b, r, c))
        semantics = ("parallel", "parallel", "parallel")

    cost = pl.CostEstimate(flops=n, transcendentals=0,
                           bytes_accessed=n * (itemsize_in + itemsize_out))

    # Alias x -> out only when the caller actually donates x (otherwise XLA
    # would insert a defensive copy) and the dtype is unchanged.
    io_aliases = {1: 0} if (donate_input and out_dtype == x.dtype) else {}

    out3 = pl.pallas_call(
        _scale_kernel,
        out_shape=jax.ShapeDtypeStruct((B, R, C), out_dtype),
        grid=grid,
        in_specs=[
            pl.BlockSpec(memory_space=pltpu.SMEM),  # (1,) scale scalar
            in_spec,                                # streamed input tile
        ],
        out_specs=out_spec,
        compiler_params=pltpu.CompilerParams(
            dimension_semantics=semantics,
            vmem_limit_bytes=_VMEM_LIMIT_BYTES),
        cost_estimate=cost,
        input_output_aliases=io_aliases,
    )(scale, x3)

    return out3.reshape(orig_shape)


class ScalePallas:
    """Mirror of the PyTorch Scale module (deterministic init)."""

    def __init__(self, init_value: float = 1.0):
        # nn.Parameter(torch.FloatTensor([init_value])) -> shape (1,) float32
        self.scale = jnp.asarray([init_value], dtype=jnp.float32)

    def __call__(self, x: jax.Array) -> jax.Array:
        return scale_forward(x, self.scale)


if __name__ == "__main__":
    key = jax.random.PRNGKey(0)

    module = ScalePallas(init_value=1.0)
    # Use a non-trivial scale value to actually exercise the multiply.
    module.scale = jnp.asarray([1.5], dtype=jnp.float32)

    # Primary case: small NCHW feature map as fed to Scale in MEInst/FCOS heads.
    x = jax.random.normal(key, (2, 4, 16, 16), dtype=jnp.float32)
    out = jax.block_until_ready(module(x))
    assert out.shape == x.shape and out.dtype == jnp.float32
    assert jnp.allclose(out, x * 1.5, atol=1e-6, rtol=1e-6)

    # Trailing dims not multiples of (8, 128): handled natively, no pad/slice.
    x2 = jax.random.normal(jax.random.PRNGKey(1), (2, 4, 15, 17), dtype=jnp.float32)
    out2 = jax.block_until_ready(module(x2))
    assert out2.shape == x2.shape
    assert jnp.allclose(out2, x2 * 1.5, atol=1e-6, rtol=1e-6)

    # bf16 input: PyTorch promotion -> float32 output (f32 math in-kernel).
    x3 = jax.random.normal(jax.random.PRNGKey(2), (2, 4, 16, 16), dtype=jnp.bfloat16)
    out3 = jax.block_until_ready(module(x3))
    ref3 = x3.astype(jnp.float32) * 1.5
    assert out3.dtype == jnp.float32
    assert jnp.allclose(out3, ref3, atol=1e-2, rtol=1e-2)

    # Larger lane-dense map: exercises the multi-block (megacore-split) grid.
    x4 = jax.random.normal(jax.random.PRNGKey(3), (8, 16, 32, 128), dtype=jnp.float32)
    out4 = jax.block_until_ready(module(x4))
    assert out4.shape == x4.shape
    assert jnp.allclose(out4, x4 * 1.5, atol=1e-6, rtol=1e-6)

    # 1-D input: exercises the rank-<2 canonicalization path.
    x5 = jax.random.normal(jax.random.PRNGKey(4), (1000,), dtype=jnp.float32)
    out5 = jax.block_until_ready(module(x5))
    assert out5.shape == x5.shape
    assert jnp.allclose(out5, x5 * 1.5, atol=1e-6, rtol=1e-6)

    print("KERNEL_OK")
</pallas_src>

<mosaic_0001>
module attributes {stable_mosaic.version = 11 : i64} {
  func.func @_scale_kernel(%arg0: i32, %arg1: memref<1xf32, #tpu.memory_space<smem>>, %arg2: memref<8x16x16xf32, #tpu.memory_space<vmem>>, %arg3: memref<8x16x16xf32, #tpu.memory_space<vmem>>) attributes {dimension_semantics = [#tpu.dimension_semantics<parallel>], iteration_bounds = array<i64: 1>, scalar_prefetch = 0 : i64, scratch_operands = 0 : i64, tpu.core_type = #tpu.core_type<tc>, window_params = [{transform_indices = @transform_0, window_bounds = array<i64: 1>}, {transform_indices = @transform_1, window_bounds = array<i64: 8, 16, 16>}, {transform_indices = @transform_2, window_bounds = array<i64: 8, 16, 16>}]} {
    %c0 = arith.constant 0 : index
    %c0_0 = arith.constant 0 : index
    %c0_1 = arith.constant 0 : index
    %0 = vector.load %arg2[%c0, %c0_0, %c0_1] : memref<8x16x16xf32, #tpu.memory_space<vmem>>, vector<8x16x16xf32>
    %c0_2 = arith.constant 0 : index
    %1 = memref.load %arg1[%c0_2] : memref<1xf32, #tpu.memory_space<smem>>
    %2 = vector.broadcast %1 : f32 to vector<8x16x16xf32>
    %3 = arith.mulf %0, %2 : vector<8x16x16xf32>
    %c0_3 = arith.constant 0 : index
    %c0_4 = arith.constant 0 : index
    %c0_5 = arith.constant 0 : index
    %4 = vector.load %arg3[%c0_3, %c0_4, %c0_5] : memref<8x16x16xf32, #tpu.memory_space<vmem>>, vector<8x16x16xf32>
    tpu.vector_store %arg3[%c0_3, %c0_4, %c0_5], %3 {strides = array<i32>} : memref<8x16x16xf32, #tpu.memory_space<vmem>>, vector<8x16x16xf32>,
    return
  }
  func.func @transform_0(%arg0: i32) -> i32 {
    %c0_i32 = arith.constant 0 : i32
    %c0_i32_0 = arith.constant 0 : i32
    return %c0_i32 : i32
  }
  func.func @transform_1(%arg0: i32) -> (i32, i32, i32) {
    %c0_i32 = arith.constant 0 : i32
    %c0_i32_0 = arith.constant 0 : i32
    %c0_i32_1 = arith.constant 0 : i32
    return %arg0, %c0_i32, %c0_i32_0 : i32, i32, i32
  }
  func.func @transform_2(%arg0: i32) -> (i32, i32, i32) {
    %c0_i32 = arith.constant 0 : i32
    %c0_i32_0 = arith.constant 0 : i32
    %c0_i32_1 = arith.constant 0 : i32
    return %arg0, %c0_i32, %c0_i32_0 : i32, i32, i32
  }
}

</mosaic_0001>

<bundles_post_ra>
// kernel: tpu_custom_call.1
= control target key start
LH: loop header
LB: loop body
LE: loop exit
PB: predicated region body
PF: predicated region fallthrough
CT: control target
= control target key end

     0   :  { %8 = vsyncpa [#allocation4], 0  ;;  %s205_s0 = inlined_call_operand.<no memory space> [shape: f32[1], index: 0, kind: input, shape index: {}]   ;;  %s206_s1 = inlined_call_operand.hbm [shape: f32[8,16,16], index: 1, kind: input, shape index: {}]   ;;  %s207_s2 = inlined_call_operand.hbm [shape: f32[8,16,16], index: 2, kind: output, shape index: {}]  }
   0x1   :  { %9 = vsyncpa [#allocation5], 0  ;;  %s16_s11 = sshll.u32 %s206_s1, 4  ;;  %s155_s12 = smov [#allocation3]   ;;  %s17_s11 = int_to_ptr.hbm [resolvable:$true] %s16_s11 }
   0x2   :  { %s18_s13 = sshll.u32 %s155_s12, 4  ;;  %s156_s14 = smov 128   ;;  %s19_s13 = int_to_ptr.vmem [resolvable:$true] %s18_s13 }
   0x3   :  { %s157_s15 = smov 8  }
   0x4   :  { %24 = dma.hbm_to_vmem [thread:$0]  %s17_s11, 2048, %s19_s13, [#allocation4], %s156_s14, %s156_s14, %s157_s15  }
   0x5   :  { %151 = dma.done.wait [#allocation4], 2048  }
   0x6   :  { %152 = vsyncadd [#allocation4], 4294965248  ;;  %v46_v0 = vstv %s205_s0  ;;  %v29_v1 = vld [vmem:[#allocation3] sm:$0xff]  ;;  %vm63_vm0 = vcmask 130048   ;;  %v30_v2 = vld [vmem:[#allocation3 + $0x8] sm:$0xff]  ;;  %s158_s0 = smov [#allocation6]  }
   0x7   :  { %v31_v3 = vld [vmem:[#allocation3 + $0x10] sm:$0xff]  ;;  %v47_v4 = vmul.f32 %v46_v0, %v29_v1  ;;  %v48_v5 = vmul.f32 %v46_v0, %v30_v2  ;;  %v32_v7 = vld [vmem:[#allocation3 + $0x18] sm:$0xff]  ;;  %v33_v8 = vld [vmem:[#allocation3 + $0x20] sm:$0xff]  ;;  %s84_s1 = sshll.u32 %s158_s0, 4  ;;  %s86_s20 = sshll.u32 %s207_s2, 4  ;;  %s85_s1 = int_to_ptr.vmem [resolvable:$true] %s84_s1  ;;  %s87_s20 = int_to_ptr.hbm [resolvable:$true] %s86_s20 }
   0x8   :  { %v49_v6 = vmul.f32 %v46_v0, %v31_v3  ;;  %v34_v9 = vld [vmem:[#allocation3 + $0x28] sm:$0xff]  ;;  %v50_v10 = vmul.f32 %v46_v0, %v32_v7  ;;  %v35_v11 = vld [vmem:[#allocation3 + $0x30] sm:$0xff]  ;;  %v51_v12 = vmul.f32 %v46_v0, %v33_v8  ;;  %v36_v13 = vld [vmem:[#allocation3 + $0x38] sm:$0xff] }
   0x9   :  { %64 = vst.msk [vmem:[#allocation6] sm:$0xff] %vm63_vm0, %v47_v4  ;;  %v52_v14 = vmul.f32 %v46_v0, %v34_v9  ;;  %v37_v15 = vld [vmem:[#allocation3 + $0x40] sm:$0xff]  ;;  %v53_v16 = vmul.f32 %v46_v0, %v35_v11  ;;  %v38_v17 = vld [vmem:[#allocation3 + $0x48] sm:$0xff]  ;;  %v54_v18 = vmul.f32 %v46_v0, %v36_v13  ;;  %v39_v19 = vld [vmem:[#allocation3 + $0x50] sm:$0xff] }
   0xa   :  { %65 = vst.msk [vmem:[#allocation6 + $0x8] sm:$0xff] %vm63_vm0, %v48_v5  ;;  %v55_v20 = vmul.f32 %v46_v0, %v37_v15  ;;  %v40_v21 = vld [vmem:[#allocation3 + $0x58] sm:$0xff]  ;;  %v56_v22 = vmul.f32 %v46_v0, %v38_v17  ;;  %v41_v23 = vld [vmem:[#allocation3 + $0x60] sm:$0xff]  ;;  %v57_v24 = vmul.f32 %v46_v0, %v39_v19  ;;  %v42_v25 = vld [vmem:[#allocation3 + $0x68] sm:$0xff] }
   0xb   :  { %66 = vst.msk [vmem:[#allocation6 + $0x10] sm:$0xff] %vm63_vm0, %v49_v6  ;;  %v58_v26 = vmul.f32 %v46_v0, %v40_v21  ;;  %v43_v27 = vld [vmem:[#allocation3 + $0x70] sm:$0xff]  ;;  %v59_v28 = vmul.f32 %v46_v0, %v41_v23  ;;  %v44_v29 = vld [vmem:[#allocation3 + $0x78] sm:$0xff]  ;;  %v60_v30 = vmul.f32 %v46_v0, %v42_v25 }
   0xc   :  { %67 = vst.msk [vmem:[#allocation6 + $0x18] sm:$0xff] %vm63_vm0, %v50_v10  ;;  %v61_v31 = vmul.f32 %v46_v0, %v43_v27  ;;  %v62_v32 = vmul.f32 %v46_v0, %v44_v29 }
   0xd   :  { %68 = vst.msk [vmem:[#allocation6 + $0x20] sm:$0xff] %vm63_vm0, %v51_v12 }
   0xe   :  { %69 = vst.msk [vmem:[#allocation6 + $0x28] sm:$0xff] %vm63_vm0, %v52_v14 }
   0xf   :  { %70 = vst.msk [vmem:[#allocation6 + $0x30] sm:$0xff] %vm63_vm0, %v53_v16 }
  0x10   :  { %71 = vst.msk [vmem:[#allocation6 + $0x38] sm:$0xff] %vm63_vm0, %v54_v18 }
  0x11   :  { %72 = vst.msk [vmem:[#allocation6 + $0x40] sm:$0xff] %vm63_vm0, %v55_v20 }
  0x12   :  { %73 = vst.msk [vmem:[#allocation6 + $0x48] sm:$0xff] %vm63_vm0, %v56_v22 }
  0x13   :  { %74 = vst.msk [vmem:[#allocation6 + $0x50] sm:$0xff] %vm63_vm0, %v57_v24 }
  0x14   :  { %75 = vst.msk [vmem:[#allocation6 + $0x58] sm:$0xff] %vm63_vm0, %v58_v26 }
  0x15   :  { %76 = vst.msk [vmem:[#allocation6 + $0x60] sm:$0xff] %vm63_vm0, %v59_v28 }
  0x16   :  { %77 = vst.msk [vmem:[#allocation6 + $0x68] sm:$0xff] %vm63_vm0, %v60_v30 }
  0x17   :  { %78 = vst.msk [vmem:[#allocation6 + $0x70] sm:$0xff] %vm63_vm0, %v61_v31 }
  0x18   :  { %79 = vst.msk [vmem:[#allocation6 + $0x78] sm:$0xff] %vm63_vm0, %v62_v32 }
  0x19   :  { %92 = dma.vmem_to_hbm [thread:$0]  %s85_s1, 2048, %s87_s20, [#allocation5], %s156_s14, %s156_s14, %s157_s15  }
  0x1a   :  { %153 = dma.done.wait [#allocation5], 2048  }
  0x1b   :  { %154 = vsyncadd [#allocation5], 4294965248 }
  0x1c   :  { %97 = vsyncpa [#allocation4], 1 }
  0x1d   :  { %98 = vsyncpa [#allocation5], 1 }

</bundles_post_ra>
